<compile_context>
chip_gen: v7x
topology: tpu7x:2x2x1
jax: 0.10.0
libtpu: 0.0.40
codegen_flags: <defaults>
</compile_context>

<pallas_src>
import functools

import jax
import jax.numpy as jnp
from jax.experimental import pallas as pl
from jax.experimental.pallas import tpu as pltpu


def _round_up(x: int, m: int) -> int:
    return (x + m - 1) // m * m


def _classblock_kernel(x_ref, w1_ref, shift_ref, w2_ref, b2_ref, o_ref,
                       *, negative_slope):
    # x_ref:     (bm, Dp)  bf16 input rows (zero-padded features)
    # w1_ref:    (Dp, Hp)  bf16 fc1 weight, pre-transposed, BN scale folded in
    # shift_ref: (1,  Hp)  f32 folded shift: beta + (b1 - mean) * scale
    # w2_ref:    (Hp, Cp)  bf16 classifier weight, pre-transposed
    # b2_ref:    (1,  Cp)  f32 classifier bias
    # o_ref:     (bm, Cp)
    h = jnp.dot(x_ref[...], w1_ref[...], preferred_element_type=jnp.float32)
    h = h + shift_ref[...]
    if negative_slope is not None:                      # LeakyReLU(0.1)
        h = jnp.where(h >= 0.0, h, negative_slope * h)
    out = jnp.dot(h.astype(jnp.bfloat16), w2_ref[...],
                  preferred_element_type=jnp.float32)
    o_ref[...] = (out + b2_ref[...]).astype(o_ref.dtype)


class ClassBlock:
    """Pallas (inference) equivalent of torchreid's ClassBlock."""

    def __init__(self, input_dim, class_num, dropout=True, relu=True,
                 num_bottleneck=512, eps=1e-5, key=None, dtype=jnp.float32):
        self.input_dim = input_dim
        self.class_num = class_num
        self.num_bottleneck = num_bottleneck
        self.relu = relu
        self.dropout = dropout            # eval mode: identity
        self.eps = eps
        self.dtype = dtype

        if key is None:
            key = jax.random.PRNGKey(0)
        k1, k2, k3, k4, k5 = jax.random.split(key, 5)
        # Parameters in PyTorch layout (Linear weight is (out, in)).
        self.params = {
            "w1": (jax.random.normal(k1, (num_bottleneck, input_dim), dtype)
                   * (2.0 / input_dim) ** 0.5),                       # kaiming-ish
            "b1": jnp.zeros((num_bottleneck,), dtype),
            "gamma": 1.0 + 0.02 * jax.random.normal(k2, (num_bottleneck,), dtype),
            "beta": jnp.zeros((num_bottleneck,), dtype),
            "mean": 0.1 * jax.random.normal(k3, (num_bottleneck,), dtype),
            "var": jnp.abs(1.0 + 0.1 * jax.random.normal(k4, (num_bottleneck,), dtype)),
            "w2": 0.001 * jax.random.normal(k5, (class_num, num_bottleneck), dtype),
            "b2": jnp.zeros((class_num,), dtype),
        }

        # ---- precompute / cache padded, folded, bf16 operands (once) ----
        D, H, C = input_dim, num_bottleneck, class_num
        self.Dp = _round_up(D, 128)
        self.Hp = _round_up(H, 128)
        self.Cp = _round_up(C, 128)
        p = self.params

        inv_std = 1.0 / jnp.sqrt(p["var"].astype(jnp.float32) + eps)
        scale = p["gamma"].astype(jnp.float32) * inv_std                 # (H,)
        shift = (p["beta"].astype(jnp.float32)
                 + (p["b1"].astype(jnp.float32)
                    - p["mean"].astype(jnp.float32)) * scale)            # (H,)

        # Fold BN scale into W1 (exact, in f32), then transpose/pad/cast.
        w1t_f32 = p["w1"].astype(jnp.float32).T * scale[None, :]         # (D, H)
        self.w1t = (jnp.zeros((self.Dp, self.Hp), jnp.bfloat16)
                    .at[:D, :H].set(w1t_f32.astype(jnp.bfloat16)))
        self.w2t = (jnp.zeros((self.Hp, self.Cp), jnp.bfloat16)
                    .at[:H, :C].set(p["w2"].astype(jnp.float32).T
                                    .astype(jnp.bfloat16)))
        self.shift_p = (jnp.zeros((1, self.Hp), jnp.float32)
                        .at[0, :H].set(shift))
        self.b2_p = (jnp.zeros((1, self.Cp), jnp.float32)
                     .at[0, :C].set(p["b2"].astype(jnp.float32)))

        # Materialize the cached operands now so __call__ pays no repack cost.
        self.w1t, self.w2t, self.shift_p, self.b2_p = jax.block_until_ready(
            (self.w1t, self.w2t, self.shift_p, self.b2_p))

    def __call__(self, x):
        # x: (B, input_dim) -> (B, class_num)
        B, D = x.shape
        C = self.class_num
        Dp, Hp, Cp = self.Dp, self.Hp, self.Cp
        out_dtype = x.dtype

        # ---- batch tile selection (8-multiple small, 128 medium, 256 large) ----
        if B <= 128:
            bm = _round_up(B, 8)
        elif B < 512:
            bm = 128          # >=2 grid steps already -> both v7x TCs busy
        else:
            bm = 256          # fill the 256-tall MXU on v6e/v7x
        Bp = _round_up(B, bm)

        # ---- only the activation pad/cast is per-call ----
        x_p = (jnp.zeros((Bp, Dp), jnp.bfloat16)
               .at[:B, :D].set(x.astype(jnp.bfloat16)))

        kernel = functools.partial(
            _classblock_kernel,
            negative_slope=0.1 if self.relu else None)

        flops = 2 * Bp * (Dp * Hp + Hp * Cp)
        bytes_accessed = (x_p.size * 2 + self.w1t.size * 2 + self.w2t.size * 2
                          + self.shift_p.size * 4 + self.b2_p.size * 4
                          + Bp * Cp * jnp.dtype(out_dtype).itemsize)

        resident = functools.partial(pl.BlockSpec,
                                     pipeline_mode=pl.Buffered(1))

        out_p = pl.pallas_call(
            kernel,
            out_shape=jax.ShapeDtypeStruct((Bp, Cp), out_dtype),
            grid_spec=pltpu.PrefetchScalarGridSpec(
                num_scalar_prefetch=0,
                grid=(Bp // bm,),
                in_specs=[
                    pl.BlockSpec((bm, Dp), lambda i: (i, 0)),       # x rows
                    resident((Dp, Hp), lambda i: (0, 0)),           # W1t (scale folded)
                    resident((1, Hp), lambda i: (0, 0)),            # shift
                    resident((Hp, Cp), lambda i: (0, 0)),           # W2t
                    resident((1, Cp), lambda i: (0, 0)),            # b2
                ],
                out_specs=pl.BlockSpec((bm, Cp), lambda i: (i, 0)),
            ),
            compiler_params=pltpu.CompilerParams(
                dimension_semantics=("parallel",),
                vmem_limit_bytes=32 * 1024 * 1024),
            cost_estimate=pl.CostEstimate(
                flops=flops, transcendentals=0,
                bytes_accessed=bytes_accessed),
        )(x_p, self.w1t, self.shift_p, self.w2t, self.b2_p)

        return out_p[:B, :C]


def _reference(x, p, relu=True, eps=1e-5):
    """Pure-JAX eval-mode reference of ClassBlock.forward (f32)."""
    z = x.astype(jnp.float32) @ p["w1"].T.astype(jnp.float32) + p["b1"]
    inv_std = 1.0 / jnp.sqrt(p["var"].astype(jnp.float32) + eps)
    z = (z - p["mean"]) * inv_std * p["gamma"] + p["beta"]
    if relu:
        z = jnp.where(z >= 0.0, z, 0.1 * z)
    return z @ p["w2"].T.astype(jnp.float32) + p["b2"]


if __name__ == "__main__":
    key = jax.random.PRNGKey(0)
    kx, kp = jax.random.split(key)

    B, input_dim, num_bottleneck, class_num = 8, 256, 512, 128
    x = jax.random.normal(kx, (B, input_dim), dtype=jnp.float32)

    block = ClassBlock(input_dim, class_num, dropout=True, relu=True,
                       num_bottleneck=num_bottleneck, key=kp)

    y = block(x)
    y = jax.block_until_ready(y)

    y_ref = _reference(x, block.params, relu=True)

    assert y.shape == (B, class_num)
    err = jnp.max(jnp.abs(y.astype(jnp.float32) - y_ref))
    # bf16 operands with f32 accumulation: loosened tolerance vs the f32 ref.
    tol = 2e-2 * (1.0 + jnp.max(jnp.abs(y_ref)))
    assert err < tol, f"max abs err {err} exceeds tol {tol}"

    print("KERNEL_OK")
</pallas_src>

<mosaic_0001>
module attributes {stable_mosaic.version = 11 : i64} {
  func.func @_classblock_kernel(%arg0: i32, %arg1: memref<8x256xbf16, #tpu.memory_space<vmem>>, %arg2: memref<256x512xbf16, #tpu.memory_space<vmem>>, %arg3: memref<1x512xf32, #tpu.memory_space<vmem>>, %arg4: memref<512x128xbf16, #tpu.memory_space<vmem>>, %arg5: memref<1x128xf32, #tpu.memory_space<vmem>>, %arg6: memref<8x128xf32, #tpu.memory_space<vmem>>) attributes {dimension_semantics = [#tpu.dimension_semantics<parallel>], iteration_bounds = array<i64: 1>, scalar_prefetch = 0 : i64, scratch_operands = 0 : i64, tpu.core_type = #tpu.core_type<tc>, window_params = [{transform_indices = @transform_0, window_bounds = array<i64: 8, 256>}, {pipeline_mode = #tpu.pipeline_mode<synchronous>, transform_indices = @transform_1, window_bounds = array<i64: 256, 512>}, {pipeline_mode = #tpu.pipeline_mode<synchronous>, transform_indices = @transform_2, window_bounds = array<i64: 1, 512>}, {pipeline_mode = #tpu.pipeline_mode<synchronous>, transform_indices = @transform_3, window_bounds = array<i64: 512, 128>}, {pipeline_mode = #tpu.pipeline_mode<synchronous>, transform_indices = @transform_4, window_bounds = array<i64: 1, 128>}, {transform_indices = @transform_5, window_bounds = array<i64: 8, 128>}]} {
    %c0 = arith.constant 0 : index
    %c0_0 = arith.constant 0 : index
    %0 = vector.load %arg1[%c0, %c0_0] : memref<8x256xbf16, #tpu.memory_space<vmem>>, vector<8x256xbf16>
    %c0_1 = arith.constant 0 : index
    %c0_2 = arith.constant 0 : index
    %1 = vector.load %arg2[%c0_1, %c0_2] : memref<256x512xbf16, #tpu.memory_space<vmem>>, vector<256x512xbf16>
    %cst = arith.constant dense<0.000000e+00> : vector<8x512xf32>
    %2 = tpu.matmul %0, %1, %cst {dimension_numbers = #tpu.dot_dimension_numbers<[1], [0], [0], [1], [0, 0, 1, 1], [], []>} : vector<8x256xbf16>, vector<256x512xbf16>, vector<8x512xf32> -> vector<8x512xf32>
    %c0_3 = arith.constant 0 : index
    %c0_4 = arith.constant 0 : index
    %3 = vector.load %arg3[%c0_3, %c0_4] : memref<1x512xf32, #tpu.memory_space<vmem>>, vector<1x512xf32>
    %4 = vector.broadcast %3 : vector<1x512xf32> to vector<8x512xf32>
    %5 = arith.addf %2, %4 : vector<8x512xf32>
    %cst_5 = arith.constant 0.000000e+00 : f32
    %6 = vector.broadcast %cst_5 : f32 to vector<8x512xf32>
    %7 = arith.cmpf oge, %5, %6 : vector<8x512xf32>
    %cst_6 = arith.constant 1.000000e-01 : f32
    %8 = vector.broadcast %cst_6 : f32 to vector<8x512xf32>
    %9 = arith.mulf %8, %5 : vector<8x512xf32>
    %10 = arith.select %7, %5, %9 : vector<8x512xi1>, vector<8x512xf32>
    %11 = arith.truncf %10 : vector<8x512xf32> to vector<8x512xbf16>
    %c0_7 = arith.constant 0 : index
    %c0_8 = arith.constant 0 : index
    %12 = vector.load %arg4[%c0_7, %c0_8] : memref<512x128xbf16, #tpu.memory_space<vmem>>, vector<512x128xbf16>
    %cst_9 = arith.constant dense<0.000000e+00> : vector<8x128xf32>
    %13 = tpu.matmul %11, %12, %cst_9 {dimension_numbers = #tpu.dot_dimension_numbers<[1], [0], [0], [1], [0, 0, 1, 1], [], []>} : vector<8x512xbf16>, vector<512x128xbf16>, vector<8x128xf32> -> vector<8x128xf32>
    %c0_10 = arith.constant 0 : index
    %c0_11 = arith.constant 0 : index
    %14 = vector.load %arg5[%c0_10, %c0_11] : memref<1x128xf32, #tpu.memory_space<vmem>>, vector<1x128xf32>
    %15 = vector.broadcast %14 : vector<1x128xf32> to vector<8x128xf32>
    %16 = arith.addf %13, %15 : vector<8x128xf32>
    %c0_12 = arith.constant 0 : index
    %c0_13 = arith.constant 0 : index
    %17 = vector.load %arg6[%c0_12, %c0_13] : memref<8x128xf32, #tpu.memory_space<vmem>>, vector<8x128xf32>
    tpu.vector_store %arg6[%c0_12, %c0_13], %16 {strides = array<i32>} : memref<8x128xf32, #tpu.memory_space<vmem>>, vector<8x128xf32>,
    return
  }
  func.func @transform_0(%arg0: i32) -> (i32, i32) {
    %c0_i32 = arith.constant 0 : i32
    %c0_i32_0 = arith.constant 0 : i32
    return %arg0, %c0_i32 : i32, i32
  }
  func.func @transform_1(%arg0: i32) -> (i32, i32) {
    %c0_i32 = arith.constant 0 : i32
    %c0_i32_0 = arith.constant 0 : i32
    %c0_i32_1 = arith.constant 0 : i32
    return %c0_i32, %c0_i32_0 : i32, i32
  }
  func.func @transform_2(%arg0: i32) -> (i32, i32) {
    %c0_i32 = arith.constant 0 : i32
    %c0_i32_0 = arith.constant 0 : i32
    %c0_i32_1 = arith.constant 0 : i32
    return %c0_i32, %c0_i32_0 : i32, i32
  }
  func.func @transform_3(%arg0: i32) -> (i32, i32) {
    %c0_i32 = arith.constant 0 : i32
    %c0_i32_0 = arith.constant 0 : i32
    %c0_i32_1 = arith.constant 0 : i32
    return %c0_i32, %c0_i32_0 : i32, i32
  }
  func.func @transform_4(%arg0: i32) -> (i32, i32) {
    %c0_i32 = arith.constant 0 : i32
    %c0_i32_0 = arith.constant 0 : i32
    %c0_i32_1 = arith.constant 0 : i32
    return %c0_i32, %c0_i32_0 : i32, i32
  }
  func.func @transform_5(%arg0: i32) -> (i32, i32) {
    %c0_i32 = arith.constant 0 : i32
    %c0_i32_0 = arith.constant 0 : i32
    return %arg0, %c0_i32 : i32, i32
  }
}

</mosaic_0001>

<bundles_post_ra>
// kernel: tpu_custom_call.1
= control target key start
LH: loop header
LB: loop body
LE: loop exit
PB: predicated region body
PF: predicated region fallthrough
CT: control target
= control target key end

     0   :  { %10 = vsyncpa [#allocation3], 0  ;;  %s1400_s0 = inlined_call_operand.hbm [shape: bf16[8,256], index: 0, kind: input, shape index: {}]   ;;  %s1401_s1 = inlined_call_operand.hbm [shape: bf16[256,512], index: 1, kind: input, shape index: {}]   ;;  %s1402_s2 = inlined_call_operand.vmem [shape: f32[1,512], index: 2, kind: input, shape index: {}]   ;;  %s1403_s3 = inlined_call_operand.hbm [shape: bf16[512,128], index: 3, kind: input, shape index: {}]   ;;  %s1404_s4 = inlined_call_operand.vmem [shape: f32[1,128], index: 4, kind: input, shape index: {}]   ;;  %s1405_s5 = inlined_call_operand.hbm [shape: f32[8,128], index: 5, kind: output, shape index: {}]  }
   0x1   :  { %11 = vsyncpa [#allocation6], 0 }
   0x2   :  { %12 = vsyncpa [#allocation4], 0  ;;  %s1308_s18 = smov [#allocation5]   ;;  %s1214_s22 = scalar_lea.hbm %s1401_s1, 8192 }
   0x3   :  { %s28_s19 = sshll.u32 %s1308_s18, 4  ;;  %p1215_p0 = scmp.ne.s32.totalorder %s1401_s1, %s1214_s22  ;;  %s29_s19 = int_to_ptr.vmem [resolvable:$true] %s28_s19 }
   0x4   :  { %p1218_p1 = scmp.lt.u32.totalorder %s1214_s22, %s1401_s1 }
   0x6   :  { %p1220_p2 = pnand %p1218_p1, %p1215_p0 }
   0x8   :  { %1223 = shalt.err (!%p1220_p2)
}
   0x9   :  { %s1224_s27 = scalar_lea.vmem %s29_s19, 8192  ;;  %p1229_p4 = scmp.lt.s32.totalorder %s29_s19, %s29_s19 }
   0xa   :  { %p1225_p3 = scmp.ne.s32.totalorder %s29_s19, %s1224_s27  ;;  %p1230_p5 = scmp.lt.s32.totalorder %s1224_s27, %s1224_s27 }
   0xc   :  { %p1231_p6 = por %p1230_p5, %p1229_p4 }
   0xe   :  { %p1232_p7 = pnand %p1231_p6, %p1225_p3 }
  0x10   :  { %1235 = shalt.err (!%p1232_p7)
}
  0x11   :  { %s1309_s28 = smov 256   ;;  %s1310_s29 = smov 16  }
  0x12   :  { %34 = dma.hbm_to_vmem [thread:$0]  %s1401_s1, 8192, %s29_s19, [#allocation6], %s1309_s28, %s1309_s28, %s1310_s29  }
  0x13   :  { %s1311_s7 = smov [#allocation2]   ;;  %s1312_s9 = smov [#allocation7]  }
  0x14   :  { %s19_s8 = sshll.u32 %s1311_s7, 4  ;;  %s42_s10 = sshll.u32 %s1312_s9, 4  ;;  %s20_s8 = int_to_ptr.vmem [resolvable:$true] %s19_s8  ;;  %s43_s10 = int_to_ptr.vmem [resolvable:$true] %s42_s10 }
  0x15   :  { %s1236_s13 = scalar_lea.hbm %s1400_s0, 128 }
  0x16   :  { %p1237_p8 = scmp.ne.s32.totalorder %s1400_s0, %s1236_s13  ;;  %p1240_p9 = scmp.lt.u32.totalorder %s1236_s13, %s1400_s0 }
  0x18   :  { %p1242_p10 = pnand %p1240_p9, %p1237_p8 }
  0x1a   :  { %1245 = shalt.err (!%p1242_p10)
}
  0x1b   :  { %s1246_s1 = scalar_lea.vmem %s20_s8, 128  ;;  %p1251_p12 = scmp.lt.s32.totalorder %s20_s8, %s20_s8 }
  0x1c   :  { %p1247_p11 = scmp.ne.s32.totalorder %s20_s8, %s1246_s1  ;;  %p1252_p13 = scmp.lt.s32.totalorder %s1246_s1, %s1246_s1 }
  0x1e   :  { %p1253_p0 = por %p1252_p13, %p1251_p12 }
  0x20   :  { %p1254_p1 = pnand %p1253_p0, %p1247_p11 }
  0x22   :  { %1257 = shalt.err (!%p1254_p1)
}
  0x23   :  { %22 = dma.hbm_to_vmem [thread:$0]  %s1400_s0, 128, %s20_s8, [#allocation3]  }
  0x24   :  { %s1258_s22 = scalar_lea.hbm %s1403_s3, 4096 }
  0x25   :  { %p1259_p2 = scmp.ne.s32.totalorder %s1403_s3, %s1258_s22  ;;  %p1262_p3 = scmp.lt.u32.totalorder %s1258_s22, %s1403_s3 }
  0x27   :  { %p1264_p4 = pnand %p1262_p3, %p1259_p2 }
  0x29   :  { %1267 = shalt.err (!%p1264_p4)
}
  0x2a   :  { %s1268_s27 = scalar_lea.vmem %s43_s10, 4096  ;;  %p1273_p6 = scmp.lt.s32.totalorder %s43_s10, %s43_s10 }
  0x2b   :  { %p1269_p5 = scmp.ne.s32.totalorder %s43_s10, %s1268_s27  ;;  %p1274_p7 = scmp.lt.s32.totalorder %s1268_s27, %s1268_s27 }
  0x2d   :  { %p1275_p8 = por %p1274_p7, %p1273_p6 }
  0x2f   :  { %p1276_p9 = pnand %p1275_p8, %p1269_p5 }
  0x31   :  { %1279 = shalt.err (!%p1276_p9)
}
  0x32   :  { %s1313_s0 = smov 64   ;;  %s1314_s28 = smov 4  }
  0x33   :  { %48 = dma.hbm_to_vmem [thread:$0]  %s1403_s3, 4096, %s43_s10, [#allocation6], %s1313_s0, %s1313_s0, %s1314_s28  }
  0x34   :  { %1302 = dma.done.wait [#allocation3], 128  }
  0x35   :  { %1303 = vsyncadd [#allocation3], 4294967168 }
  0x36   :  { %1304 = dma.done.wait [#allocation6], 12288  }
  0x37   :  { %1305 = vsyncadd [#allocation6], 4294955008  ;;  %v1084_v0 = vld [vmem:[#allocation5 + $0x4] ss:$16 sps:$4 sm:$0xff]   ;;  %v1086_v1 = vld [vmem:[#allocation5 + $0xc] ss:$16 sps:$4 sm:$0xff]  }
  0x38   :  { %475 = vmatprep.subr.bf16.mxu0 %v1084_v0  ;;  %v1088_v2 = vld [vmem:[#allocation5] ss:$16 sps:$4 sm:$0xff]   ;;  %v1089_v3 = vld [vmem:[#allocation5 + $0x8] ss:$16 sps:$4 sm:$0xff]   ;;  %516 = vmatprep.subr.bf16.mxu1 %v1086_v1  ;;  %v1090_v4 = vld [vmem:[#allocation5 + $0x24] ss:$16 sps:$4 sm:$0xff]  }
  0x39   :  { %476 = vmatpush1.bf16.msra.mxu0 %v1088_v2  ;;  %517 = vmatpush1.bf16.msra.mxu1 %v1089_v3  ;;  %v1092_v5 = vld [vmem:[#allocation5 + $0x2c] ss:$16 sps:$4 sm:$0xff]   ;;  %v1094_v6 = vld [vmem:[#allocation5 + $0x20] ss:$16 sps:$4 sm:$0xff]   ;;  %v1095_v7 = vld [vmem:[#allocation5 + $0x28] ss:$16 sps:$4 sm:$0xff]  }
  0x3a   :  { %477 = vmatprep.subr.bf16.mxu0 %v1090_v4  ;;  %518 = vmatprep.subr.bf16.mxu1 %v1092_v5  ;;  %v1096_v8 = vld [vmem:[#allocation5 + $0x44] ss:$16 sps:$4 sm:$0xff]   ;;  %v1098_v9 = vld [vmem:[#allocation5 + $0x4c] ss:$16 sps:$4 sm:$0xff]   ;;  %v1100_v10 = vld [vmem:[#allocation5 + $0x40] ss:$16 sps:$4 sm:$0xff]  }
  0x3b   :  { %v1101_v11 = vld [vmem:[#allocation5 + $0x48] ss:$16 sps:$4 sm:$0xff]   ;;  %v1102_v12 = vld [vmem:[#allocation5 + $0x64] ss:$16 sps:$4 sm:$0xff]   ;;  %v1104_v13 = vld [vmem:[#allocation5 + $0x6c] ss:$16 sps:$4 sm:$0xff]  }
  0x3c   :  { %v1106_v14 = vld [vmem:[#allocation5 + $0x60] ss:$16 sps:$4 sm:$0xff]   ;;  %v1107_v15 = vld [vmem:[#allocation5 + $0x68] ss:$16 sps:$4 sm:$0xff]   ;;  %v1108_v16 = vld [vmem:[#allocation5 + $0x84] ss:$16 sps:$4 sm:$0xff]  }
  0x3d   :  { %478 = vmatpush1.bf16.msra.mxu0 %v1094_v6  ;;  %519 = vmatpush1.bf16.msra.mxu1 %v1095_v7  ;;  %v1110_v17 = vld [vmem:[#allocation5 + $0x8c] ss:$16 sps:$4 sm:$0xff]   ;;  %v1112_v18 = vld [vmem:[#allocation5 + $0x80] ss:$16 sps:$4 sm:$0xff]   ;;  %v1113_v19 = vld [vmem:[#allocation5 + $0x88] ss:$16 sps:$4 sm:$0xff]  }
  0x3e   :  { %479 = vmatprep.subr.bf16.mxu0 %v1096_v8  ;;  %520 = vmatprep.subr.bf16.mxu1 %v1098_v9  ;;  %v1114_v20 = vld [vmem:[#allocation5 + $0xa4] ss:$16 sps:$4 sm:$0xff]   ;;  %v1116_v21 = vld [vmem:[#allocation5 + $0xac] ss:$16 sps:$4 sm:$0xff]   ;;  %v1118_v22 = vld [vmem:[#allocation5 + $0xa0] ss:$16 sps:$4 sm:$0xff]  }
  0x3f   :  { %v1119_v23 = vld [vmem:[#allocation5 + $0xa8] ss:$16 sps:$4 sm:$0xff]   ;;  %v1120_v24 = vld [vmem:[#allocation5 + $0xc4] ss:$16 sps:$4 sm:$0xff]   ;;  %v1122_v25 = vld [vmem:[#allocation5 + $0xcc] ss:$16 sps:$4 sm:$0xff]  }
  0x40   :  { %v1124_v26 = vld [vmem:[#allocation5 + $0xc0] ss:$16 sps:$4 sm:$0xff]   ;;  %v1125_v27 = vld [vmem:[#allocation5 + $0xc8] ss:$16 sps:$4 sm:$0xff]   ;;  %v1126_v28 = vld [vmem:[#allocation5 + $0xe4] ss:$16 sps:$4 sm:$0xff]  }
  0x41   :  { %480 = vmatpush1.bf16.msra.mxu0 %v1100_v10  ;;  %521 = vmatpush1.bf16.msra.mxu1 %v1101_v11  ;;  %v1128_v29 = vld [vmem:[#allocation5 + $0xec] ss:$16 sps:$4 sm:$0xff]   ;;  %v1130_v30 = vld [vmem:[#allocation5 + $0xe0] ss:$16 sps:$4 sm:$0xff]   ;;  %v1131_v31 = vld [vmem:[#allocation5 + $0xe8] ss:$16 sps:$4 sm:$0xff]  }
  0x42   :  { %481 = vmatprep.subr.bf16.mxu0 %v1102_v12  ;;  %522 = vmatprep.subr.bf16.mxu1 %v1104_v13  ;;  %v1132_v32 = vld [vmem:[#allocation5 + $0x104] ss:$16 sps:$4 sm:$0xff]   ;;  %v1134_v33 = vld [vmem:[#allocation5 + $0x10c] ss:$16 sps:$4 sm:$0xff]   ;;  %v1136_v34 = vld [vmem:[#allocation5 + $0x100] ss:$16 sps:$4 sm:$0xff]  }
  0x43   :  { %v1137_v35 = vld [vmem:[#allocation5 + $0x108] ss:$16 sps:$4 sm:$0xff]   ;;  %v1138_v36 = vld [vmem:[#allocation5 + $0x124] ss:$16 sps:$4 sm:$0xff]   ;;  %v1140_v37 = vld [vmem:[#allocation5 + $0x12c] ss:$16 sps:$4 sm:$0xff]  }
  0x44   :  { %v1142_v38 = vld [vmem:[#allocation5 + $0x120] ss:$16 sps:$4 sm:$0xff]   ;;  %v1143_v39 = vld [vmem:[#allocation5 + $0x128] ss:$16 sps:$4 sm:$0xff]   ;;  %v1144_v40 = vld [vmem:[#allocation5 + $0x144] ss:$16 sps:$4 sm:$0xff]  }
  0x45   :  { %482 = vmatpush1.bf16.msra.mxu0 %v1106_v14  ;;  %523 = vmatpush1.bf16.msra.mxu1 %v1107_v15  ;;  %v1146_v41 = vld [vmem:[#allocation5 + $0x14c] ss:$16 sps:$4 sm:$0xff]   ;;  %v1148_v42 = vld [vmem:[#allocation5 + $0x140] ss:$16 sps:$4 sm:$0xff]   ;;  %v1149_v43 = vld [vmem:[#allocation5 + $0x148] ss:$16 sps:$4 sm:$0xff]  }
  0x46   :  { %483 = vmatprep.subr.bf16.mxu0 %v1108_v16  ;;  %524 = vmatprep.subr.bf16.mxu1 %v1110_v17  ;;  %v1150_v44 = vld [vmem:[#allocation5 + $0x164] ss:$16 sps:$4 sm:$0xff]   ;;  %v1152_v45 = vld [vmem:[#allocation5 + $0x16c] ss:$16 sps:$4 sm:$0xff]   ;;  %v1154_v46 = vld [vmem:[#allocation5 + $0x160] ss:$16 sps:$4 sm:$0xff]  }
  0x47   :  { %v61_v47 = vld [vmem:[#allocation2] sm:$0xff]  ;;  %v1156_v50 = vld [vmem:[#allocation5 + $0x184] ss:$16 sps:$4 sm:$0xff]   ;;  %v1160_v52 = vld [vmem:[#allocation5 + $0x180] ss:$16 sps:$4 sm:$0xff]   ;;  %s1315_s8 = smov [#allocation8]  }
  0x48   :  { %v1155_v48 = vld [vmem:[#allocation5 + $0x168] ss:$16 sps:$4 sm:$0xff]   ;;  %v934_v49 = vcombine.high %v61_v47, %v61_v47  ;;  %v1158_v51 = vld [vmem:[#allocation5 + $0x18c] ss:$16 sps:$4 sm:$0xff]   ;;  %v1162_v54 = vld [vmem:[#allocation5 + $0x1a4] ss:$16 sps:$4 sm:$0xff]   ;;  %v933_v5 = vcombine.low %v61_v47, %v61_v47 }
  0x49   :  { %484 = vmatpush1.bf16.msra.mxu0 %v1112_v18  ;;  %525 = vmatpush1.bf16.msra.mxu1 %v1113_v19  ;;  %v1161_v53 = vld [vmem:[#allocation5 + $0x188] ss:$16 sps:$4 sm:$0xff]   ;;  %v1164_v55 = vld [vmem:[#allocation5 + $0x1ac] ss:$16 sps:$4 sm:$0xff]   ;;  %v1166_v56 = vld [vmem:[#allocation5 + $0x1a0] ss:$16 sps:$4 sm:$0xff]  }
  0x4a   :  { %485 = vmatprep.subr.bf16.mxu0 %v1114_v20  ;;  %526 = vmatprep.subr.bf16.mxu1 %v1116_v21  ;;  %v1167_v57 = vld [vmem:[#allocation5 + $0x1a8] ss:$16 sps:$4 sm:$0xff]   ;;  %v1168_v58 = vld [vmem:[#allocation5 + $0x1c4] ss:$16 sps:$4 sm:$0xff]   ;;  %v1170_v59 = vld [vmem:[#allocation5 + $0x1cc] ss:$16 sps:$4 sm:$0xff]  }
  0x4b   :  { %507 = vmatprep.mubr.bf16.mxu0 %v934_v49  ;;  %548 = vmatprep.mubr.bf16.mxu1 %v934_v49  ;;  %v1172_v60 = vld [vmem:[#allocation5 + $0x1c0] ss:$16 sps:$4 sm:$0xff]   ;;  %v1173_v61 = vld [vmem:[#allocation5 + $0x1c8] ss:$16 sps:$4 sm:$0xff]   ;;  %v1174_v62 = vld [vmem:[#allocation5 + $0x1e4] ss:$16 sps:$4 sm:$0xff]  }
  0x4c   :  { %v1176_v63 = vld [vmem:[#allocation5 + $0x1ec] ss:$16 sps:$4 sm:$0xff]   ;;  %v1178_v0 = vld [vmem:[#allocation5 + $0x1e0] ss:$16 sps:$4 sm:$0xff]   ;;  %v1179_v1 = vld [vmem:[#allocation5 + $0x1e8] ss:$16 sps:$4 sm:$0xff]  }
  0x4d   :  { %486 = vmatpush1.bf16.msra.mxu0 %v1118_v22  ;;  %527 = vmatpush1.bf16.msra.mxu1 %v1119_v23  ;;  %v1182_v2 = vld [vmem:[#allocation7 + $0x40] sm:$0xff]   ;;  %v1186_v7 = vld [vmem:[#allocation7 + $0x48] sm:$0xff]   ;;  %v1190_v11 = vld [vmem:[#allocation7 + $0x50] sm:$0xff]   ;;  %s923_s9 = sshll.u32 %s1315_s8, 4  ;;  %s924_s9 = int_to_ptr.vmem [resolvable:$true] %s923_s9 }
  0x4e   :  { %487 = vmatprep.subr.bf16.mxu0 %v1120_v24  ;;  %528 = vmatprep.subr.bf16.mxu1 %v1122_v25  ;;  %v1183_v3 = vld [vmem:[#allocation7 + $0xc0] sm:$0xff]   ;;  %v1187_v8 = vld [vmem:[#allocation7 + $0xc8] sm:$0xff]   ;;  %v1191_v12 = vld [vmem:[#allocation7 + $0xd0] sm:$0xff]   ;;  %s1280_s10 = scalar_lea.vmem %s924_s9, 128  ;;  %p1285_p11 = scmp.lt.s32.totalorder %s924_s9, %s924_s9 }
  0x4f   :  { %v1184_v4 = vld [vmem:[#allocation7] sm:$0xff]   ;;  %v1188_v9 = vld [vmem:[#allocation7 + $0x8] sm:$0xff]   ;;  %v1192_v13 = vld [vmem:[#allocation7 + $0x10] sm:$0xff]   ;;  %p1281_p10 = scmp.ne.s32.totalorder %s924_s9, %s1280_s10  ;;  %p1286_p12 = scmp.lt.s32.totalorder %s1280_s10, %s1280_s10 }
  0x50   :  { %v1185_v6 = vld [vmem:[#allocation7 + $0x80] sm:$0xff]   ;;  %v1189_v10 = vld [vmem:[#allocation7 + $0x88] sm:$0xff]   ;;  %v1193_v14 = vld [vmem:[#allocation7 + $0x90] sm:$0xff]  }
  0x51   :  { %488 = vmatpush1.bf16.msra.mxu0 %v1124_v26  ;;  %529 = vmatpush1.bf16.msra.mxu1 %v1125_v27  ;;  %v1194_v15 = vld [vmem:[#allocation7 + $0x58] sm:$0xff]   ;;  %v1198_v19 = vld [vmem:[#allocation7 + $0x60] sm:$0xff]   ;;  %v1202_v23 = vld [vmem:[#allocation7 + $0x68] sm:$0xff]   ;;  %p1287_p13 = por %p1286_p12, %p1285_p11 }
  0x52   :  { %489 = vmatprep.subr.bf16.mxu0 %v1126_v28  ;;  %530 = vmatprep.subr.bf16.mxu1 %v1128_v29  ;;  %v1195_v16 = vld [vmem:[#allocation7 + $0xd8] sm:$0xff]   ;;  %v1199_v20 = vld [vmem:[#allocation7 + $0xe0] sm:$0xff]   ;;  %v1203_v24 = vld [vmem:[#allocation7 + $0xe8] sm:$0xff]  }
  0x53   :  { %v1196_v17 = vld [vmem:[#allocation7 + $0x18] sm:$0xff]   ;;  %v1200_v21 = vld [vmem:[#allocation7 + $0x20] sm:$0xff]   ;;  %v1204_v25 = vld [vmem:[#allocation7 + $0x28] sm:$0xff]   ;;  %p1288_p0 = pnand %p1287_p13, %p1281_p10 }
  0x54   :  { %v1197_v18 = vld [vmem:[#allocation7 + $0x98] sm:$0xff]   ;;  %v1201_v22 = vld [vmem:[#allocation7 + $0xa0] sm:$0xff]   ;;  %v1205_v26 = vld [vmem:[#allocation7 + $0xa8] sm:$0xff]  }
  0x55   :  { %490 = vmatpush1.bf16.msra.mxu0 %v1130_v30  ;;  %531 = vmatpush1.bf16.msra.mxu1 %v1131_v31  ;;  %v1206_v27 = vld [vmem:[#allocation7 + $0x70] sm:$0xff]   ;;  %v1210_v31 = vld [vmem:[#allocation7 + $0x78] sm:$0xff]  }
  0x56   :  { %491 = vmatprep.subr.bf16.mxu0 %v1132_v32  ;;  %532 = vmatprep.subr.bf16.mxu1 %v1134_v33  ;;  %v1207_v28 = vld [vmem:[#allocation7 + $0xf0] sm:$0xff]   ;;  %v1211_v32 = vld [vmem:[#allocation7 + $0xf8] sm:$0xff]  }
  0x57   :  { %v1208_v29 = vld [vmem:[#allocation7 + $0x30] sm:$0xff]   ;;  %v1212_v33 = vld [vmem:[#allocation7 + $0x38] sm:$0xff]  }
  0x58   :  { %v1209_v30 = vld [vmem:[#allocation7 + $0xb0] sm:$0xff]  }
  0x59   :  { %492 = vmatpush1.bf16.msra.mxu0 %v1136_v34  ;;  %533 = vmatpush1.bf16.msra.mxu1 %v1137_v35  ;;  %v1213_v34 = vld [vmem:[#allocation7 + $0xb8] sm:$0xff]   ;;  %v128_v35 = vlaneseq }
  0x5a   :  { %493 = vmatprep.subr.bf16.mxu0 %v1138_v36  ;;  %534 = vmatprep.subr.bf16.mxu1 %v1140_v37 }
  0x5b   :  { %v129_v36 = vshrl.u32 %v128_v35, 7 }
  0x5d   :  { %494 = vmatpush1.bf16.msra.mxu0 %v1142_v38  ;;  %535 = vmatpush1.bf16.msra.mxu1 %v1143_v39  ;;  %v130_v37 = vsub.s32 0, %v129_v36  ;;  %v138_v38 = vsub.s32 2, %v129_v36  ;;  %v126_v39 = vld [vmem:[%s1402_s2] sm:$0xf] }
  0x5e   :  { %495 = vmatprep.subr.bf16.mxu0 %v1144_v40  ;;  %536 = vmatprep.subr.bf16.mxu1 %v1146_v41  ;;  %v134_v40 = vsub.s32 1, %v129_v36  ;;  %v142_v41 = vsub.s32 3, %v129_v36 }
  0x61   :  { %496 = vmatpush1.bf16.msra.mxu0 %v1148_v42  ;;  %537 = vmatpush1.bf16.msra.mxu1 %v1149_v43  ;;  %v131_v42 = vrot.slane %v126_v39, %v130_v37  ;;  %v139_v43 = vrot.slane %v126_v39, %v138_v38 }
  0x62   :  { %497 = vmatprep.subr.bf16.mxu0 %v1150_v44  ;;  %538 = vmatprep.subr.bf16.mxu1 %v1152_v45  ;;  %v135_v44 = vrot.slane %v126_v39, %v134_v40  ;;  %v143_v45 = vrot.slane %v126_v39, %v142_v41 }
  0x65   :  { %498 = vmatpush1.bf16.msra.mxu0 %v1154_v46  ;;  %539 = vmatpush1.bf16.msra.mxu1 %v1155_v48 }
  0x66   :  { %499 = vmatprep.subr.bf16.mxu0 %v1156_v50  ;;  %540 = vmatprep.subr.bf16.mxu1 %v1158_v51 }
  0x69   :  { %500 = vmatpush1.bf16.msra.mxu0 %v1160_v52  ;;  %541 = vmatpush1.bf16.msra.mxu1 %v1161_v53 }
  0x6a   :  { %501 = vmatprep.subr.bf16.mxu0 %v1162_v54  ;;  %542 = vmatprep.subr.bf16.mxu1 %v1164_v55 }
  0x6d   :  { %502 = vmatpush1.bf16.msra.mxu0 %v1166_v56  ;;  %543 = vmatpush1.bf16.msra.mxu1 %v1167_v57 }
  0x6e   :  { %503 = vmatprep.subr.bf16.mxu0 %v1168_v58  ;;  %544 = vmatprep.subr.bf16.mxu1 %v1170_v59 }
  0x71   :  { %504 = vmatpush1.bf16.msra.mxu0 %v1172_v60  ;;  %545 = vmatpush1.bf16.msra.mxu1 %v1173_v61 }
  0x72   :  { %505 = vmatprep.subr.bf16.mxu0 %v1174_v62  ;;  %546 = vmatprep.subr.bf16.mxu1 %v1176_v63 }
  0x75   :  { %506 = vmatpush1.bf16.msra.mxu0 %v1178_v0  ;;  %547 = vmatpush1.bf16.msra.mxu1 %v1179_v1 }
  0x76   :  { %1032 = vmatprep.subr.bf16.mxu0 %v1182_v2  ;;  %1054 = vmatprep.subr.bf16.mxu1 %v1183_v3 }
  0x78   :  { %508 = vmatmul.mubr.bf16.vlgmr.msra.gmra.mrb[0].mxu0 %v933_v5  ;;  %549 = vmatmul.mubr.bf16.vlgmr.msra.gmra.mrb[0].mxu1 %v933_v5 }
  0x79   :  { %1033 = vmatpush3.bf16.msra.mxu0 %v1184_v4  ;;  %1055 = vmatpush3.bf16.msra.mxu1 %v1185_v6 }
  0x7a   :  { %1034 = vmatprep.subr.bf16.mxu0 %v1186_v7  ;;  %1056 = vmatprep.subr.bf16.mxu1 %v1187_v8  ;;  %v999_v8 = vld [vmem:[%s1404_s4] ss:$0 sm:$0xff] }
  0x7d   :  { %1035 = vmatpush3.bf16.msra.mxu0 %v1188_v9  ;;  %1057 = vmatpush3.bf16.msra.mxu1 %v1189_v10 }
  0x7e   :  { %1036 = vmatprep.subr.bf16.mxu0 %v1190_v11  ;;  %1058 = vmatprep.subr.bf16.mxu1 %v1191_v12 }
  0x81   :  { %1037 = vmatpush3.bf16.msra.mxu0 %v1192_v13  ;;  %1059 = vmatpush3.bf16.msra.mxu1 %v1193_v14 }
  0x82   :  { %1038 = vmatprep.subr.bf16.mxu0 %v1194_v15  ;;  %1060 = vmatprep.subr.bf16.mxu1 %v1195_v16 }
  0x85   :  { %1039 = vmatpush3.bf16.msra.mxu0 %v1196_v17  ;;  %1061 = vmatpush3.bf16.msra.mxu1 %v1197_v18 }
  0x86   :  { %1040 = vmatprep.subr.bf16.mxu0 %v1198_v19  ;;  %1062 = vmatprep.subr.bf16.mxu1 %v1199_v20 }
  0x89   :  { %1041 = vmatpush3.bf16.msra.mxu0 %v1200_v21  ;;  %1063 = vmatpush3.bf16.msra.mxu1 %v1201_v22 }
  0x8a   :  { %1042 = vmatprep.subr.bf16.mxu0 %v1202_v23  ;;  %1064 = vmatprep.subr.bf16.mxu1 %v1203_v24 }
  0x8d   :  { %1043 = vmatpush3.bf16.msra.mxu0 %v1204_v25  ;;  %1065 = vmatpush3.bf16.msra.mxu1 %v1205_v26 }
  0x8e   :  { %1044 = vmatprep.subr.bf16.mxu0 %v1206_v27  ;;  %1066 = vmatprep.subr.bf16.mxu1 %v1207_v28 }
  0x91   :  { %1045 = vmatpush3.bf16.msra.mxu0 %v1208_v29  ;;  %1067 = vmatpush3.bf16.msra.mxu1 %v1209_v30 }
  0x92   :  { %1046 = vmatprep.subr.bf16.mxu0 %v1210_v31  ;;  %1068 = vmatprep.subr.bf16.mxu1 %v1211_v32 }
  0x95   :  { %1047 = vmatpush3.bf16.msra.mxu0 %v1212_v33  ;;  %1069 = vmatpush3.bf16.msra.mxu1 %v1213_v34 }
 0x14b   :  { %v509_v46 = vpop.f32.mrb[0].mxu0  ;;  %v550_v47 = vpop.f32.mrb[0].mxu1 }
 0x14c   :  { %v510_v48 = vadd.f32 %v509_v46, %v131_v42  ;;  %v551_v49 = vadd.f32 %v550_v47, %v139_v43  ;;  %v511_v50 = vpop.f32.mrb[1].mxu0  ;;  %v552_v51 = vpop.f32.mrb[1].mxu1 }
 0x14d   :  { %v512_v52 = vadd.f32 %v511_v50, %v135_v44  ;;  %v553_v53 = vadd.f32 %v552_v51, %v143_v45  ;;  %v513_v54 = vpop.f32.mrb[2].mxu0  ;;  %v554_v55 = vpop.f32.mrb[2].mxu1 }
 0x14e   :  { %vm557_vm0 = vcmp.ge.f32.partialorder %v510_v48, 0.0  ;;  %v561_v56 = vmul.f32 0.1, %v510_v48  ;;  %vm559_vm1 = vcmp.ge.f32.partialorder %v551_v49, 0.0  ;;  %v563_v57 = vmul.f32 0.1, %v551_v49 }
 0x14f   :  { %vm558_vm2 = vcmp.ge.f32.partialorder %v512_v52, 0.0  ;;  %v562_v58 = vmul.f32 0.1, %v512_v52  ;;  %vm560_vm3 = vcmp.ge.f32.partialorder %v553_v53, 0.0  ;;  %v564_v59 = vmul.f32 0.1, %v553_v53 }
 0x150   :  { %v565_v60 = vsel %vm557_vm0, %v510_v48, %v561_v56  ;;  %v567_v61 = vsel %vm559_vm1, %v551_v49, %v563_v57  ;;  %v514_v62 = vpop.f32.mrb[3].mxu0  ;;  %v555_v63 = vpop.f32.mrb[3].mxu1 }
 0x151   :  { %v566_v0 = vsel %vm558_vm2, %v512_v52, %v562_v58  ;;  %v568_v1 = vsel %vm560_vm3, %v553_v53, %v564_v59  ;;  %v569_v4 = vpack.c.bf16 %v565_v60, %v565_v60  ;;  %v571_v5 = vpack.c.bf16 %v567_v61, %v567_v61 }
 0x152   :  { %v570_v2 = vpack.c.bf16 %v566_v0, %v566_v0  ;;  %v572_v3 = vpack.c.bf16 %v568_v1, %v568_v1 }
 0x154   :  { %868 = vmatprep.mubr.bf16.mxu0 %v570_v2  ;;  %908 = vmatprep.mubr.bf16.mxu1 %v572_v3 }
 0x155   :  { %869 = vmatmul.mubr.bf16.vlgmr.msra.gmra.mrb[4].mxu0 %v569_v4  ;;  %909 = vmatmul.mubr.bf16.vlgmr.msra.gmra.mrb[4].mxu1 %v571_v5 }
 0x228   :  { %v1048_v6 = vpop.f32.mrb[4].mxu0  ;;  %v1070_v7 = vpop.f32.mrb[4].mxu1 }
 0x229   :  { %v1049_v9 = vpop.f32.mrb[5].mxu0  ;;  %v1071_v10 = vpop.f32.mrb[5].mxu1 }
 0x22a   :  { %v1050_v11 = vadd.f32 %v1049_v9, %v1048_v6  ;;  %v1072_v12 = vadd.f32 %v1071_v10, %v1070_v7  ;;  %v1051_v13 = vpop.f32.mrb[6].mxu0  ;;  %v1073_v14 = vpop.f32.mrb[6].mxu1 }
 0x22b   :  { %v1052_v15 = vpop.f32.mrb[7].mxu0  ;;  %v1074_v16 = vpop.f32.mrb[7].mxu1 }
 0x22c   :  { %v871_v17 = vadd.f32 %v1050_v11, %v999_v8 }
 0x22e   :  { %v911_v18 = vadd.f32 %v1072_v12, %v871_v17 }
 0x230   :  { %916 = vst [vmem:[#allocation8] sm:$0xff] %v911_v18 }
 0x231   :  { %1291 = shalt.err (!%p1288_p0)
}
 0x232   :  { %s1292_s12 = scalar_lea.hbm %s1405_s5, 128 }
 0x233   :  { %p1293_p1 = scmp.ne.s32.totalorder %s1405_s5, %s1292_s12  ;;  %p1296_p2 = scmp.lt.u32.totalorder %s1292_s12, %s1405_s5 }
 0x235   :  { %p1298_p3 = pnand %p1296_p2, %p1293_p1 }
 0x237   :  { %1301 = shalt.err (!%p1298_p3)
}
 0x238   :  { %926 = dma.vmem_to_hbm [thread:$0]  %s924_s9, 128, %s1405_s5, [#allocation4]  }
 0x239   :  { %1306 = dma.done.wait [#allocation4], 128  }
 0x23a   :  { %1307 = vsyncadd [#allocation4], 4294967168 }
 0x23b   :  { %930 = vsyncpa [#allocation3], 1 }
 0x23c   :  { %931 = vsyncpa [#allocation6], 1 }
 0x23d   :  { %932 = vsyncpa [#allocation4], 1 }

</bundles_post_ra>
